<compile_context>
chip_gen: v5e
topology: v5e:2x2
jax: 0.10.0
libtpu: 0.0.40
codegen_flags: <defaults>
</compile_context>

<pallas_src>
import functools

import jax
import jax.numpy as jnp
from jax.experimental import pallas as pl
from jax.experimental.pallas import tpu as pltpu

LANES = 128  # lane-dense padded output width


def _ceil_to(x, m):
    return ((x + m - 1) // m) * m


def linear_kernel(x_ref, w_ref, b_ref, o_ref):
    # x_ref: (TM, IN)      activation tile (batch-tiled)
    # w_ref: (IN, 128)     zero-padded transposed weight, VMEM-resident
    # b_ref: (1, 128)      zero-padded bias, VMEM-resident
    # o_ref: (TM, 128)     lane-dense output tile
    x = x_ref[...].astype(jnp.float32)
    w = w_ref[...].astype(jnp.float32)
    acc = jnp.zeros(o_ref.shape, jnp.float32)
    # K = 10: statically unrolled VPU FMA chain; keeps the MXU out of the
    # picture entirely for this tiny contraction.
    for k in range(x.shape[1]):
        acc = acc + x[:, k:k + 1] * w[k:k + 1, :]
    o_ref[...] = (acc + b_ref[...].astype(jnp.float32)).astype(o_ref.dtype)


@functools.partial(jax.jit, static_argnames=("block_m",))
def linear_pallas(x, weight, bias, *, block_m=512):
    """y = x @ weight.T + bias  (PyTorch nn.Linear semantics).

    x:      (B, IN)   float32
    weight: (OUT, IN) float32   (PyTorch layout)
    bias:   (OUT,)    float32
    """
    B, IN = x.shape
    OUT = weight.shape[0]

    # Batch tile: as large as reasonable, but never larger than the
    # sublane-rounded batch itself.
    tm = min(block_m, _ceil_to(B, 8))
    b_pad = _ceil_to(B, tm)
    if b_pad != B:
        x = jnp.pad(x, ((0, b_pad - B), (0, 0)))

    # Lane-dense weight / bias: zero outside the first OUT columns.
    w_p = jnp.zeros((IN, LANES), x.dtype).at[:, :OUT].set(weight.T)
    b_p = jnp.zeros((1, LANES), x.dtype).at[:, :OUT].set(bias[None, :])

    grid = (b_pad // tm,)
    flops = 2 * b_pad * IN * LANES
    bytes_accessed = 4 * (b_pad * IN + IN * LANES + LANES + b_pad * LANES)

    y_p = pl.pallas_call(
        linear_kernel,
        out_shape=jax.ShapeDtypeStruct((b_pad, LANES), x.dtype),
        grid=grid,
        in_specs=[
            pl.BlockSpec((tm, IN), lambda i: (i, 0)),      # x: tiled over batch
            pl.BlockSpec((IN, LANES), lambda i: (0, 0)),   # W: VMEM-resident
            pl.BlockSpec((1, LANES), lambda i: (0, 0)),    # b: VMEM-resident
        ],
        out_specs=pl.BlockSpec((tm, LANES), lambda i: (i, 0)),
        compiler_params=pltpu.CompilerParams(
            dimension_semantics=("parallel",),             # megacore on v7x
        ),
        cost_estimate=pl.CostEstimate(
            flops=flops, transcendentals=0, bytes_accessed=bytes_accessed),
    )(x, w_p, b_p)

    # Strip batch padding and the lane padding of the output.
    return y_p[:B, :OUT]


def init_params(key, in_features=10, out_features=5):
    # Mimics PyTorch nn.Linear default init: U(-1/sqrt(in), 1/sqrt(in)).
    kw, kb = jax.random.split(key)
    bound = 1.0 / jnp.sqrt(jnp.float32(in_features))
    weight = jax.random.uniform(
        kw, (out_features, in_features), jnp.float32, -bound, bound)
    bias = jax.random.uniform(kb, (out_features,), jnp.float32, -bound, bound)
    return weight, bias


if __name__ == "__main__":
    key = jax.random.PRNGKey(0)
    k_x, k_p, k_x2 = jax.random.split(key, 3)

    in_features, out_features = 10, 5
    weight, bias = init_params(k_p, in_features, out_features)

    # Small shape matching the toy PyTorch module usage.
    x_small = jax.random.normal(k_x, (8, in_features), jnp.float32)
    y_small = linear_pallas(x_small, weight, bias)
    jax.block_until_ready(y_small)
    ref_small = x_small @ weight.T + bias
    assert y_small.shape == (8, out_features)
    assert jnp.allclose(y_small, ref_small, atol=1e-5, rtol=1e-5), \
        "small-batch mismatch vs reference"

    # Larger, non-tile-aligned batch to exercise the tiled / padded path.
    x_big = jax.random.normal(k_x2, (1037, in_features), jnp.float32)
    y_big = linear_pallas(x_big, weight, bias, block_m=512)
    jax.block_until_ready(y_big)
    ref_big = x_big @ weight.T + bias
    assert y_big.shape == (1037, out_features)
    assert jnp.allclose(y_big, ref_big, atol=1e-4, rtol=1e-4), \
        "tiled-batch mismatch vs reference"

    print("KERNEL_OK")
</pallas_src>

<mosaic_0001>
module attributes {stable_mosaic.version = 11 : i64} {
  func.func @linear_kernel(%arg0: i32, %arg1: memref<8x10xf32, #tpu.memory_space<vmem>>, %arg2: memref<10x128xf32, #tpu.memory_space<vmem>>, %arg3: memref<1x128xf32, #tpu.memory_space<vmem>>, %arg4: memref<8x128xf32, #tpu.memory_space<vmem>>) attributes {dimension_semantics = [#tpu.dimension_semantics<parallel>], iteration_bounds = array<i64: 1>, scalar_prefetch = 0 : i64, scratch_operands = 0 : i64, tpu.core_type = #tpu.core_type<tc>, window_params = [{transform_indices = @transform_0, window_bounds = array<i64: 8, 10>}, {pipeline_mode = #tpu.pipeline_mode<synchronous>, transform_indices = @transform_1, window_bounds = array<i64: 10, 128>}, {pipeline_mode = #tpu.pipeline_mode<synchronous>, transform_indices = @transform_2, window_bounds = array<i64: 1, 128>}, {transform_indices = @transform_3, window_bounds = array<i64: 8, 128>}]} {
    %c0 = arith.constant 0 : index
    %c0_0 = arith.constant 0 : index
    %0 = vector.load %arg1[%c0, %c0_0] : memref<8x10xf32, #tpu.memory_space<vmem>>, vector<8x10xf32>
    %c0_1 = arith.constant 0 : index
    %c0_2 = arith.constant 0 : index
    %1 = vector.load %arg2[%c0_1, %c0_2] : memref<10x128xf32, #tpu.memory_space<vmem>>, vector<10x128xf32>
    %cst = arith.constant 0.000000e+00 : f32
    %2 = vector.broadcast %cst : f32 to vector<8x128xf32>
    %3 = vector.extract_strided_slice %0 {offsets = [0, 0], sizes = [8, 1], strides = [1, 1]} : vector<8x10xf32> to vector<8x1xf32>
    %4 = vector.extract_strided_slice %1 {offsets = [0, 0], sizes = [1, 128], strides = [1, 1]} : vector<10x128xf32> to vector<1x128xf32>
    %5 = vector.broadcast %3 : vector<8x1xf32> to vector<8x128xf32>
    %6 = vector.broadcast %4 : vector<1x128xf32> to vector<8x128xf32>
    %7 = arith.mulf %5, %6 : vector<8x128xf32>
    %8 = arith.addf %2, %7 : vector<8x128xf32>
    %9 = vector.extract_strided_slice %0 {offsets = [0, 1], sizes = [8, 1], strides = [1, 1]} : vector<8x10xf32> to vector<8x1xf32>
    %10 = vector.extract_strided_slice %1 {offsets = [1, 0], sizes = [1, 128], strides = [1, 1]} : vector<10x128xf32> to vector<1x128xf32>
    %11 = vector.broadcast %9 : vector<8x1xf32> to vector<8x128xf32>
    %12 = vector.broadcast %10 : vector<1x128xf32> to vector<8x128xf32>
    %13 = arith.mulf %11, %12 : vector<8x128xf32>
    %14 = arith.addf %8, %13 : vector<8x128xf32>
    %15 = vector.extract_strided_slice %0 {offsets = [0, 2], sizes = [8, 1], strides = [1, 1]} : vector<8x10xf32> to vector<8x1xf32>
    %16 = vector.extract_strided_slice %1 {offsets = [2, 0], sizes = [1, 128], strides = [1, 1]} : vector<10x128xf32> to vector<1x128xf32>
    %17 = vector.broadcast %15 : vector<8x1xf32> to vector<8x128xf32>
    %18 = vector.broadcast %16 : vector<1x128xf32> to vector<8x128xf32>
    %19 = arith.mulf %17, %18 : vector<8x128xf32>
    %20 = arith.addf %14, %19 : vector<8x128xf32>
    %21 = vector.extract_strided_slice %0 {offsets = [0, 3], sizes = [8, 1], strides = [1, 1]} : vector<8x10xf32> to vector<8x1xf32>
    %22 = vector.extract_strided_slice %1 {offsets = [3, 0], sizes = [1, 128], strides = [1, 1]} : vector<10x128xf32> to vector<1x128xf32>
    %23 = vector.broadcast %21 : vector<8x1xf32> to vector<8x128xf32>
    %24 = vector.broadcast %22 : vector<1x128xf32> to vector<8x128xf32>
    %25 = arith.mulf %23, %24 : vector<8x128xf32>
    %26 = arith.addf %20, %25 : vector<8x128xf32>
    %27 = vector.extract_strided_slice %0 {offsets = [0, 4], sizes = [8, 1], strides = [1, 1]} : vector<8x10xf32> to vector<8x1xf32>
    %28 = vector.extract_strided_slice %1 {offsets = [4, 0], sizes = [1, 128], strides = [1, 1]} : vector<10x128xf32> to vector<1x128xf32>
    %29 = vector.broadcast %27 : vector<8x1xf32> to vector<8x128xf32>
    %30 = vector.broadcast %28 : vector<1x128xf32> to vector<8x128xf32>
    %31 = arith.mulf %29, %30 : vector<8x128xf32>
    %32 = arith.addf %26, %31 : vector<8x128xf32>
    %33 = vector.extract_strided_slice %0 {offsets = [0, 5], sizes = [8, 1], strides = [1, 1]} : vector<8x10xf32> to vector<8x1xf32>
    %34 = vector.extract_strided_slice %1 {offsets = [5, 0], sizes = [1, 128], strides = [1, 1]} : vector<10x128xf32> to vector<1x128xf32>
    %35 = vector.broadcast %33 : vector<8x1xf32> to vector<8x128xf32>
    %36 = vector.broadcast %34 : vector<1x128xf32> to vector<8x128xf32>
    %37 = arith.mulf %35, %36 : vector<8x128xf32>
    %38 = arith.addf %32, %37 : vector<8x128xf32>
    %39 = vector.extract_strided_slice %0 {offsets = [0, 6], sizes = [8, 1], strides = [1, 1]} : vector<8x10xf32> to vector<8x1xf32>
    %40 = vector.extract_strided_slice %1 {offsets = [6, 0], sizes = [1, 128], strides = [1, 1]} : vector<10x128xf32> to vector<1x128xf32>
    %41 = vector.broadcast %39 : vector<8x1xf32> to vector<8x128xf32>
    %42 = vector.broadcast %40 : vector<1x128xf32> to vector<8x128xf32>
    %43 = arith.mulf %41, %42 : vector<8x128xf32>
    %44 = arith.addf %38, %43 : vector<8x128xf32>
    %45 = vector.extract_strided_slice %0 {offsets = [0, 7], sizes = [8, 1], strides = [1, 1]} : vector<8x10xf32> to vector<8x1xf32>
    %46 = vector.extract_strided_slice %1 {offsets = [7, 0], sizes = [1, 128], strides = [1, 1]} : vector<10x128xf32> to vector<1x128xf32>
    %47 = vector.broadcast %45 : vector<8x1xf32> to vector<8x128xf32>
    %48 = vector.broadcast %46 : vector<1x128xf32> to vector<8x128xf32>
    %49 = arith.mulf %47, %48 : vector<8x128xf32>
    %50 = arith.addf %44, %49 : vector<8x128xf32>
    %51 = vector.extract_strided_slice %0 {offsets = [0, 8], sizes = [8, 1], strides = [1, 1]} : vector<8x10xf32> to vector<8x1xf32>
    %52 = vector.extract_strided_slice %1 {offsets = [8, 0], sizes = [1, 128], strides = [1, 1]} : vector<10x128xf32> to vector<1x128xf32>
    %53 = vector.broadcast %51 : vector<8x1xf32> to vector<8x128xf32>
    %54 = vector.broadcast %52 : vector<1x128xf32> to vector<8x128xf32>
    %55 = arith.mulf %53, %54 : vector<8x128xf32>
    %56 = arith.addf %50, %55 : vector<8x128xf32>
    %57 = vector.extract_strided_slice %0 {offsets = [0, 9], sizes = [8, 1], strides = [1, 1]} : vector<8x10xf32> to vector<8x1xf32>
    %58 = vector.extract_strided_slice %1 {offsets = [9, 0], sizes = [1, 128], strides = [1, 1]} : vector<10x128xf32> to vector<1x128xf32>
    %59 = vector.broadcast %57 : vector<8x1xf32> to vector<8x128xf32>
    %60 = vector.broadcast %58 : vector<1x128xf32> to vector<8x128xf32>
    %61 = arith.mulf %59, %60 : vector<8x128xf32>
    %62 = arith.addf %56, %61 : vector<8x128xf32>
    %c0_3 = arith.constant 0 : index
    %c0_4 = arith.constant 0 : index
    %63 = vector.load %arg3[%c0_3, %c0_4] : memref<1x128xf32, #tpu.memory_space<vmem>>, vector<1x128xf32>
    %64 = vector.broadcast %63 : vector<1x128xf32> to vector<8x128xf32>
    %65 = arith.addf %62, %64 : vector<8x128xf32>
    %c0_5 = arith.constant 0 : index
    %c0_6 = arith.constant 0 : index
    %66 = vector.load %arg4[%c0_5, %c0_6] : memref<8x128xf32, #tpu.memory_space<vmem>>, vector<8x128xf32>
    tpu.vector_store %arg4[%c0_5, %c0_6], %65 {strides = array<i32>} : memref<8x128xf32, #tpu.memory_space<vmem>>, vector<8x128xf32>,
    return
  }
  func.func @transform_0(%arg0: i32) -> (i32, i32) {
    %c0_i32 = arith.constant 0 : i32
    %c0_i32_0 = arith.constant 0 : i32
    return %arg0, %c0_i32 : i32, i32
  }
  func.func @transform_1(%arg0: i32) -> (i32, i32) {
    %c0_i32 = arith.constant 0 : i32
    %c0_i32_0 = arith.constant 0 : i32
    %c0_i32_1 = arith.constant 0 : i32
    return %c0_i32, %c0_i32_0 : i32, i32
  }
  func.func @transform_2(%arg0: i32) -> (i32, i32) {
    %c0_i32 = arith.constant 0 : i32
    %c0_i32_0 = arith.constant 0 : i32
    %c0_i32_1 = arith.constant 0 : i32
    return %c0_i32, %c0_i32_0 : i32, i32
  }
  func.func @transform_3(%arg0: i32) -> (i32, i32) {
    %c0_i32 = arith.constant 0 : i32
    %c0_i32_0 = arith.constant 0 : i32
    return %arg0, %c0_i32 : i32, i32
  }
}

</mosaic_0001>

<bundles_post_ra>
// kernel: linear_pallas.1
= control target key start
LH: loop header
LB: loop body
LE: loop exit
PB: predicated region body
PF: predicated region fallthrough
CT: control target
= control target key end

     0   :  { %v160_v1 = vmov 2   ;;  %v161_v2 = vmov 0   ;;  %s206_s0 = inlined_call_operand.vmem [shape: f32[8,10], index: 0, kind: input, shape index: {}]   ;;  %s207_s1 = inlined_call_operand.vmem [shape: f32[10,128], index: 1, kind: input, shape index: {}]   ;;  %s208_s2 = inlined_call_operand.vmem [shape: f32[1,128], index: 2, kind: input, shape index: {}]   ;;  %s209_s3 = inlined_call_operand.hbm [shape: f32[8,128], index: 3, kind: output, shape index: {}]  }
   0x1   :  { %v15_v0 = vld [vmem:[%s206_s0] sm:$0xff]  ;;  %124 = vset.pattern.permute.xlu1 %v160_v1  ;;  %122 = vset.pattern.permute.xlu0 %v161_v2 }
   0x2   :  { %8 = vsyncpa [#allocation3], 0  ;;  %34 = vperm.xlu1 %124, %v15_v0   ;;  %20 = vperm.xlu0 %122, %v15_v0   ;;  %v162_v3 = vmov 4   ;;  %v163_v4 = vmov 3   ;;  %v164_v5 = vmov 1   ;;  %v165_v6 = vmov 5  }
   0x3   :  { %126 = vset.pattern.permute.xlu2 %v162_v3  ;;  %v166_v7 = vmov 6   ;;  %v167_v8 = vmov 8   ;;  %v168_v9 = vmov 7   ;;  %v169_v10 = vmov 9   ;;  %v16_v14 = vld [vmem:[%s207_s1] sm:$0xff]  ;;  %s102_s22 = sshll.u32 %s209_s3, 4  ;;  %s103_s22 = int_to_ptr.hbm [resolvable:$true] %s102_s22 }
   0x4   :  { %48 = vperm.xlu2 %126, %v15_v0   ;;  %v23_v15 = vperm.slane %v16_v14, 0  ;;  %v30_v16 = vperm.slane %v16_v14, 1  ;;  %v37_v18 = vperm.slane %v16_v14, 2  ;;  %v44_v22 = vperm.slane %v16_v14, 3  ;;  %v17_v35 = vld [vmem:[%s207_s1 + $0x8] sm:$0x3] }
   0x5   :  { %v51_v25 = vperm.slane %v16_v14, 4  ;;  %v58_v29 = vperm.slane %v16_v14, 5  ;;  %v65_v30 = vperm.slane %v16_v14, 6  ;;  %v72_v33 = vperm.slane %v16_v14, 7  ;;  %v133_v51 = vld [vmem:[%s208_s2] ss:$0 sm:$0xff] }
   0x6   :  { %v79_v42 = vperm.slane %v17_v35, 0  ;;  %v86_v47 = vperm.slane %v17_v35, 1  ;;  %s170_s1 = smov [#allocation2]  }
   0x7   :  { %s100_s19 = sshll.u32 %s170_s1, 4  ;;  %s101_s19 = int_to_ptr.vmem [resolvable:$true] %s100_s19 }
   0xa   :  { %125 = vset.pattern.permute.xlu1 %v163_v4  ;;  %123 = vset.pattern.permute.xlu0 %v164_v5 }
   0xb   :  { %41 = vperm.xlu1 %125, %v15_v0   ;;  %27 = vperm.xlu0 %123, %v15_v0  }
   0xc   :  { %127 = vset.pattern.permute.xlu2 %v165_v6 }
   0xd   :  { %55 = vperm.xlu2 %127, %v15_v0  }
  0x13   :  { %128 = vset.pattern.permute.xlu1 %v166_v7  ;;  %130 = vset.pattern.permute.xlu0 %v167_v8 }
  0x14   :  { %62 = vperm.xlu1 %128, %v15_v0   ;;  %76 = vperm.xlu0 %130, %v15_v0  }
  0x15   :  { %129 = vset.pattern.permute.xlu2 %v168_v9 }
  0x16   :  { %69 = vperm.xlu2 %129, %v15_v0  }
  0x1c   :  { %131 = vset.pattern.permute.xlu1 %v169_v10  ;;  %132 = vset.pattern.permute.xlu0 %v169_v10 }
  0x1d   :  { %83 = vperm.xlu1 %131, %v15_v0  }
  0x5e   :  { %v49_v11 = vpop.permute.xlu2 %48 }
  0x5f   :  { %v52_v31 = vmul.f32 %v51_v25, %v49_v11 }
  0x67   :  { %v56_v17 = vpop.permute.xlu2 %55 }
  0x68   :  { %v59_v37 = vmul.f32 %v58_v29, %v56_v17 }
  0x70   :  { %v70_v34 = vpop.permute.xlu2 %69 }
  0x71   :  { %v73_v41 = vmul.f32 %v72_v33, %v70_v34 }
  0x74   :  { %v35_v12 = vpop.permute.xlu1 %34  ;;  %v21_v13 = vpop.permute.xlu0 %20 }
  0x75   :  { %v24_v21 = vmul.f32 %v23_v15, %v21_v13  ;;  %v38_v24 = vmul.f32 %v37_v18, %v35_v12 }
  0x7d   :  { %v42_v19 = vpop.permute.xlu1 %41  ;;  %v28_v20 = vpop.permute.xlu0 %27 }
  0x7e   :  { %v31_v23 = vmul.f32 %v30_v16, %v28_v20  ;;  %v45_v27 = vmul.f32 %v44_v22, %v42_v19 }
  0x80   :  { %v32_v26 = vadd.f32 %v31_v23, %v24_v21 }
  0x82   :  { %v39_v28 = vadd.f32 %v38_v24, %v32_v26 }
  0x84   :  { %v46_v32 = vadd.f32 %v45_v27, %v39_v28 }
  0x86   :  { %v53_v36 = vadd.f32 %v52_v31, %v46_v32  ;;  %v63_v38 = vpop.permute.xlu1 %62  ;;  %v77_v43 = vpop.permute.xlu0 %76 }
  0x87   :  { %v66_v39 = vmul.f32 %v65_v30, %v63_v38  ;;  %v80_v46 = vmul.f32 %v79_v42, %v77_v43 }
  0x88   :  { %v60_v40 = vadd.f32 %v59_v37, %v53_v36 }
  0x8a   :  { %v67_v44 = vadd.f32 %v66_v39, %v60_v40 }
  0x8c   :  { %v74_v45 = vadd.f32 %v73_v41, %v67_v44 }
  0x8e   :  { %v81_v49 = vadd.f32 %v80_v46, %v74_v45 }
  0x8f   :  { %v84_v48 = vpop.permute.xlu1 %83 }
  0x90   :  { %v87_v50 = vmul.f32 %v86_v47, %v84_v48 }
  0x92   :  { %v88_v52 = vadd.f32 %v87_v50, %v81_v49 }
  0x94   :  { %v93_v53 = vadd.f32 %v133_v51, %v88_v52 }
  0x96   :  { %94 = vst [vmem:[#allocation2] sm:$0xff] %v93_v53 }
  0x97   :  { %105 = dma.vmem_to_hbm [thread:$0]  %s101_s19, 128, %s103_s22, [#allocation3]  }
  0x98   :  { %158 = dma.done.wait [#allocation3], 128  }
  0x99   :  { %159 = vsyncadd [#allocation3], 4294967168 }
  0x9a   :  { %110 = vsyncpa [#allocation3], 1 }

</bundles_post_ra>
